<compile_context>
chip_gen: v5e
topology: v5e:2x2
jax: 0.10.0
libtpu: 0.0.40
codegen_flags: <defaults>
</compile_context>

<pallas_src>
import functools

import jax
import jax.numpy as jnp
import numpy as np
from jax.experimental import pallas as pl
from jax.experimental.pallas import tpu as pltpu


def _round_up(x: int, m: int) -> int:
    return ((x + m - 1) // m) * m


# ----------------------------- Pallas kernel -----------------------------

def _qy_kernel(zy_ref, w_ref, b_ref, o_ref, *, matmul_precision):
    # Fused: ReLU (VPU) -> MXU matmul with f32 accumulate -> bias add.
    h = jnp.maximum(zy_ref[...], 0)
    acc = jnp.dot(h, w_ref[...],
                  preferred_element_type=jnp.float32,
                  precision=matmul_precision)
    o_ref[...] = acc + b_ref[...]


# ----------------------------- wrapper -----------------------------

def pallas_qy(zy, w, b, *, block_m=1024, use_bf16_inputs=False):
    """loc_y = relu(zy) @ w + b as one fused Pallas TPU kernel.

    zy: (B, zy_dim) f32
    w:  (zy_dim, y_dim) f32  (torch fc1.weight transposed)
    b:  (y_dim,) f32
    """
    bsz, zy_dim = zy.shape
    y_dim = w.shape[1]
    assert w.shape == (zy_dim, y_dim)
    assert b.shape == (y_dim,)

    # Optional bf16 inputs: halves HBM read traffic (memory-bound kernel).
    in_dtype = jnp.bfloat16 if use_bf16_inputs else jnp.float32
    zy_in = zy.astype(in_dtype)
    w_in = w.astype(in_dtype)
    b_in = b.reshape(1, y_dim).astype(jnp.float32)

    # Pad the batch to a multiple of 8 so every tile is sublane-dense.
    padded = _round_up(bsz, 8)
    if padded != bsz:
        zy_in = jnp.pad(zy_in, ((0, padded - bsz), (0, 0)))

    # Batch tile: as large as possible (fewer grid steps, longer DMAs), but
    # keep >= 2 grid steps when there is enough work so the "parallel" axis
    # can be split across v7x's two TensorCores.
    block_m = _round_up(max(block_m, 8), 8)
    if padded <= 16:
        bm = padded                      # single tiny block (full array dims)
    else:
        bm = min(block_m, _round_up(pl.cdiv(padded, 2), 8))
    grid = (pl.cdiv(padded, bm),)

    bytes_in = 2 if use_bf16_inputs else 4
    cost = pl.CostEstimate(
        flops=2 * padded * zy_dim * y_dim,
        transcendentals=0,
        bytes_accessed=bytes_in * (padded * zy_dim + zy_dim * y_dim)
        + 4 * (y_dim + padded * y_dim),
    )

    kernel = functools.partial(
        _qy_kernel,
        matmul_precision=None if use_bf16_inputs else jax.lax.Precision.HIGHEST,
    )

    out = pl.pallas_call(
        kernel,
        out_shape=jax.ShapeDtypeStruct((padded, y_dim), jnp.float32),
        grid_spec=pltpu.PrefetchScalarGridSpec(
            num_scalar_prefetch=0,
            grid=grid,
            in_specs=[
                pl.BlockSpec((bm, zy_dim), lambda i: (i, 0)),      # activations (tiled)
                pl.BlockSpec((zy_dim, y_dim), lambda i: (0, 0)),   # weight (VMEM-resident)
                pl.BlockSpec((1, y_dim), lambda i: (0, 0)),        # bias   (VMEM-resident)
            ],
            out_specs=pl.BlockSpec((bm, y_dim), lambda i: (i, 0)),
        ),
        compiler_params=pltpu.CompilerParams(
            dimension_semantics=("parallel",),     # shard batch tiles across TCs (v7x)
            vmem_limit_bytes=32 * 1024 * 1024,     # explicit; safe on all generations
        ),
        cost_estimate=cost,
    )(zy_in, w_in, b_in)

    return out[:bsz] if padded != bsz else out


@jax.jit
def qy_forward(zy, params):
    return pallas_qy(zy, params["w1"], params["b1"])


# ----------------------------- reference (pure JAX) -----------------------------

def qy_reference(zy, params):
    h = jnp.maximum(zy, 0.0)
    return h @ params["w1"] + params["b1"]


# ----------------------------- params -----------------------------

def _xavier_uniform(key, shape, fan_in, fan_out):
    bound = float(np.sqrt(6.0 / (fan_in + fan_out)))
    return jax.random.uniform(key, shape, jnp.float32, -bound, bound)


def init_params(key, zy_dim, y_dim):
    # torch Linear weight is (out=y_dim, in=zy_dim); store the transpose
    # (zy_dim, y_dim) so the kernel is a plain row-major MXU matmul.
    w = _xavier_uniform(key, (zy_dim, y_dim), fan_in=zy_dim, fan_out=y_dim)
    return dict(w1=w, b1=jnp.zeros((y_dim,), jnp.float32))


# ----------------------------- main -----------------------------

if __name__ == "__main__":
    key = jax.random.PRNGKey(0)
    kz, kp = jax.random.split(key)

    batch, zy_dim, y_dim = 2, 64, 32
    zy = jax.random.normal(kz, (batch, zy_dim), jnp.float32)
    params = init_params(kp, zy_dim, y_dim)

    loc_y = jax.block_until_ready(qy_forward(zy, params))

    ref = qy_reference(zy, params)
    assert loc_y.shape == (batch, y_dim)
    assert np.allclose(np.asarray(loc_y), np.asarray(ref), rtol=1e-2, atol=1e-3)

    print("KERNEL_OK")
</pallas_src>

<mosaic_0001>
module attributes {stable_mosaic.version = 11 : i64} {
  func.func @_qy_kernel(%arg0: i32, %arg1: memref<8x64xf32, #tpu.memory_space<vmem>>, %arg2: memref<64x32xf32, #tpu.memory_space<vmem>>, %arg3: memref<1x32xf32, #tpu.memory_space<vmem>>, %arg4: memref<8x32xf32, #tpu.memory_space<vmem>>) attributes {dimension_semantics = [#tpu.dimension_semantics<parallel>], iteration_bounds = array<i64: 1>, scalar_prefetch = 0 : i64, scratch_operands = 0 : i64, tpu.core_type = #tpu.core_type<tc>, window_params = [{transform_indices = @transform_0, window_bounds = array<i64: 8, 64>}, {pipeline_mode = #tpu.pipeline_mode<synchronous>, transform_indices = @transform_1, window_bounds = array<i64: 64, 32>}, {pipeline_mode = #tpu.pipeline_mode<synchronous>, transform_indices = @transform_2, window_bounds = array<i64: 1, 32>}, {transform_indices = @transform_3, window_bounds = array<i64: 8, 32>}]} {
    %c0 = arith.constant 0 : index
    %c0_0 = arith.constant 0 : index
    %0 = vector.load %arg1[%c0, %c0_0] : memref<8x64xf32, #tpu.memory_space<vmem>>, vector<8x64xf32>
    %cst = arith.constant 0.000000e+00 : f32
    %1 = vector.broadcast %cst : f32 to vector<8x64xf32>
    %2 = arith.maximumf %0, %1 : vector<8x64xf32>
    %c0_1 = arith.constant 0 : index
    %c0_2 = arith.constant 0 : index
    %3 = vector.load %arg2[%c0_1, %c0_2] : memref<64x32xf32, #tpu.memory_space<vmem>>, vector<64x32xf32>
    %cst_3 = arith.constant dense<0.000000e+00> : vector<8x32xf32>
    %4 = tpu.matmul %2, %3, %cst_3 {dimension_numbers = #tpu.dot_dimension_numbers<[1], [0], [0], [1], [0, 0, 1, 1], [], []>, precision = #tpu.contract_precision<fp32>} : vector<8x64xf32>, vector<64x32xf32>, vector<8x32xf32> -> vector<8x32xf32>
    %c0_4 = arith.constant 0 : index
    %c0_5 = arith.constant 0 : index
    %5 = vector.load %arg3[%c0_4, %c0_5] : memref<1x32xf32, #tpu.memory_space<vmem>>, vector<1x32xf32>
    %6 = vector.broadcast %5 : vector<1x32xf32> to vector<8x32xf32>
    %7 = arith.addf %4, %6 : vector<8x32xf32>
    %c0_6 = arith.constant 0 : index
    %c0_7 = arith.constant 0 : index
    %8 = vector.load %arg4[%c0_6, %c0_7] : memref<8x32xf32, #tpu.memory_space<vmem>>, vector<8x32xf32>
    tpu.vector_store %arg4[%c0_6, %c0_7], %7 {strides = array<i32>} : memref<8x32xf32, #tpu.memory_space<vmem>>, vector<8x32xf32>,
    return
  }
  func.func @transform_0(%arg0: i32) -> (i32, i32) {
    %c0_i32 = arith.constant 0 : i32
    %c0_i32_0 = arith.constant 0 : i32
    return %arg0, %c0_i32 : i32, i32
  }
  func.func @transform_1(%arg0: i32) -> (i32, i32) {
    %c0_i32 = arith.constant 0 : i32
    %c0_i32_0 = arith.constant 0 : i32
    %c0_i32_1 = arith.constant 0 : i32
    return %c0_i32, %c0_i32_0 : i32, i32
  }
  func.func @transform_2(%arg0: i32) -> (i32, i32) {
    %c0_i32 = arith.constant 0 : i32
    %c0_i32_0 = arith.constant 0 : i32
    %c0_i32_1 = arith.constant 0 : i32
    return %c0_i32, %c0_i32_0 : i32, i32
  }
  func.func @transform_3(%arg0: i32) -> (i32, i32) {
    %c0_i32 = arith.constant 0 : i32
    %c0_i32_0 = arith.constant 0 : i32
    return %arg0, %c0_i32 : i32, i32
  }
}

</mosaic_0001>

<bundles_post_ra>
// kernel: qy_forward.1
= control target key start
LH: loop header
LB: loop body
LE: loop exit
PB: predicated region body
PF: predicated region fallthrough
CT: control target
= control target key end

     0   :  { %vm28_vm0 = vcmask 523264   ;;  %vm269_vm1 = vcmask 261120   ;;  %s416_s1 = inlined_call_operand.vmem [shape: f32[64,32], index: 1, kind: input, shape index: {}]   ;;  %s417_s2 = inlined_call_operand.vmem [shape: f32[1,32], index: 2, kind: input, shape index: {}]   ;;  %s418_s0 = inlined_call_operand.vmem [shape: f32[8,64], index: 0, kind: input, shape index: {}]   ;;  %s419_s3 = inlined_call_operand.vmem [shape: f32[8,32], index: 3, kind: output, shape index: {}]  }
   0x1   :  { %v23_v0 = vld [vmem:[%s416_s1 + $0x38] sm:$0xff]  ;;  %v22_v1 = vld [vmem:[%s416_s1 + $0x30] sm:$0xff]  ;;  %v21_v2 = vld [vmem:[%s416_s1 + $0x28] sm:$0xff] }
   0x2   :  { %v305_v3 = vand.u32 4294901760, %v23_v0  ;;  %v307_v4 = vand.u32 4294901760, %v22_v1  ;;  %v309_v5 = vand.u32 4294901760, %v21_v2  ;;  %v20_v6 = vld [vmem:[%s416_s1 + $0x20] sm:$0xff]  ;;  %v19_v7 = vld [vmem:[%s416_s1 + $0x18] sm:$0xff]  ;;  %v18_v8 = vld [vmem:[%s416_s1 + $0x10] sm:$0xff] }
   0x3   :  { %v320_v9 = vand.u32 4294901760, %v20_v6  ;;  %v322_v10 = vand.u32 4294901760, %v19_v7  ;;  %v324_v11 = vand.u32 4294901760, %v18_v8  ;;  %v17_v12 = vld [vmem:[%s416_s1 + $0x8] sm:$0xff]  ;;  %v16_v13 = vld [vmem:[%s416_s1] sm:$0xff] }
   0x4   :  { %41 = vmatpush.msra.mxu0 %v305_v3  ;;  %v334_v14 = vsub.f32 %v23_v0, %v305_v3  ;;  %v337_v15 = vsub.f32 %v22_v1, %v307_v4  ;;  %v340_v16 = vsub.f32 %v21_v2, %v309_v5  ;;  %173 = vmatpush.msra.mxu3 %v305_v3  ;;  %v343_v17 = vand.u32 4294901760, %v17_v12  ;;  %v14_v32 = vld [vmem:[%s418_s0] sm:$0xff] }
   0x5   :  { %v346_v18 = vsub.f32 %v20_v6, %v320_v9  ;;  %v349_v19 = vsub.f32 %v19_v7, %v322_v10  ;;  %v352_v20 = vsub.f32 %v18_v8, %v324_v11  ;;  %v359_v24 = vand.u32 4294901760, %v16_v13  ;;  %v275_v56 = vld [vmem:[%s417_s2] ss:$0 sm:$0xff] }
   0x6   :  { %43 = vmatpush.msra.mxu0 %v307_v4  ;;  %v75_v21 = vand.u32 4294901760, %v334_v14  ;;  %v81_v22 = vand.u32 4294901760, %v337_v15  ;;  %136 = vmatpush.msra.mxu2 %v334_v14  ;;  %v87_v23 = vand.u32 4294901760, %v340_v16  ;;  %v364_v26 = vsub.f32 %v17_v12, %v343_v17 }
   0x7   :  { %v93_v25 = vand.u32 4294901760, %v346_v18  ;;  %175 = vmatpush.msra.mxu3 %v307_v4  ;;  %v99_v30 = vand.u32 4294901760, %v349_v19  ;;  %v105_v31 = vand.u32 4294901760, %v352_v20  ;;  %v116_v36 = vsub.f32 %v16_v13, %v359_v24 }
   0x8   :  { %v76_v27 = vsub.f32 %v334_v14, %v75_v21  ;;  %45 = vmatpush.msra.mxu0 %v309_v5  ;;  %v82_v28 = vsub.f32 %v337_v15, %v81_v22  ;;  %v88_v29 = vsub.f32 %v340_v16, %v87_v23  ;;  %139 = vmatpush.msra.mxu2 %v337_v15  ;;  %v111_v39 = vand.u32 4294901760, %v364_v26 }
   0x9   :  { %177 = vmatpush.msra.mxu3 %v309_v5  ;;  %v94_v35 = vsub.f32 %v346_v18, %v93_v25  ;;  %v100_v38 = vsub.f32 %v349_v19, %v99_v30  ;;  %v15_v40 = vmax.f32 %v14_v32, 0.0  ;;  %v106_v42 = vsub.f32 %v352_v20, %v105_v31 }
   0xa   :  { %v77_v33 = vand.u32 4294901760, %v76_v27  ;;  %v83_v34 = vand.u32 4294901760, %v82_v28  ;;  %47 = vmatpush.msra.mxu0 %v320_v9  ;;  %142 = vmatpush.msra.mxu2 %v340_v16  ;;  %v89_v37 = vand.u32 4294901760, %v88_v29  ;;  %v117_v43 = vand.u32 4294901760, %v116_v36 }
   0xb   :  { %179 = vmatpush.msra.mxu3 %v320_v9  ;;  %v95_v41 = vand.u32 4294901760, %v94_v35  ;;  %v30_v44 = vsel %vm28_vm0, %v15_v40, 0  ;;  %v101_v46 = vand.u32 4294901760, %v100_v38  ;;  %v112_v47 = vsub.f32 %v364_v26, %v111_v39 }
   0xc   :  { %78 = vmatpush.msra.mxu1 %v77_v33  ;;  %49 = vmatpush.msra.mxu0 %v322_v10  ;;  %v56_v45 = vand.u32 4294901760, %v30_v44  ;;  %v107_v49 = vand.u32 4294901760, %v106_v42  ;;  %v118_v50 = vsub.f32 %v116_v36, %v117_v43 }
   0xd   :  { %145 = vmatpush.msra.mxu2 %v346_v18  ;;  %181 = vmatpush.msra.mxu3 %v322_v10  ;;  %v113_v52 = vand.u32 4294901760, %v112_v47 }
   0xe   :  { %84 = vmatpush.msra.mxu1 %v83_v34  ;;  %51 = vmatpush.msra.mxu0 %v324_v11  ;;  %v57_v48 = vsub.f32 %v30_v44, %v56_v45  ;;  %v119_v54 = vand.u32 4294901760, %v118_v50 }
   0xf   :  { %148 = vmatpush.msra.mxu2 %v349_v19  ;;  %183 = vmatpush.msra.mxu3 %v324_v11 }
  0x10   :  { %90 = vmatpush.msra.mxu1 %v89_v37  ;;  %53 = vmatpush.msra.mxu0 %v343_v17  ;;  %v58_v51 = vand.u32 4294901760, %v57_v48 }
  0x11   :  { %151 = vmatpush.msra.mxu2 %v352_v20  ;;  %185 = vmatpush.msra.mxu3 %v343_v17 }
  0x12   :  { %96 = vmatpush.msra.mxu1 %v95_v41  ;;  %55 = vmatpush.msra.mxu0 %v359_v24  ;;  %v59_v53 = vsub.f32 %v57_v48, %v58_v51 }
  0x13   :  { %154 = vmatpush.msra.mxu2 %v364_v26  ;;  %187 = vmatpush.msra.mxu3 %v359_v24 }
  0x14   :  { %206 = vmatpush.msrb.mxu0 %v75_v21  ;;  %102 = vmatpush.msra.mxu1 %v101_v46  ;;  %v60_v55 = vand.u32 4294901760, %v59_v53 }
  0x15   :  { %157 = vmatpush.msra.mxu2 %v116_v36  ;;  %191 = vmatmul.f32.vlgmr.msra.gmra.mxu3 %v58_v51 }
  0x16   :  { %210 = vmatpush.msrb.mxu0 %v81_v22  ;;  %108 = vmatpush.msra.mxu1 %v107_v49 }
  0x17   :  { %160 = vmatmul.f32.vlgmr.msra.gmra.mxu2 %v57_v48  ;;  %61 = vmatmul.f32.vlgmr.msra.gmra.mxu0 %v60_v55 }
  0x18   :  { %214 = vmatpush.msrb.mxu0 %v87_v23  ;;  %114 = vmatpush.msra.mxu1 %v113_v52 }
  0x1a   :  { %218 = vmatpush.msrb.mxu0 %v93_v25  ;;  %120 = vmatpush.msra.mxu1 %v119_v54 }
  0x1b   :  { %122 = vmatmul.f32.vlgmr.msra.gmra.mxu1 %v56_v45 }
  0x1c   :  { %249 = vmatpush.msrb.mxu1 %v305_v3  ;;  %222 = vmatpush.msrb.mxu0 %v99_v30 }
  0x1e   :  { %251 = vmatpush.msrb.mxu1 %v307_v4  ;;  %226 = vmatpush.msrb.mxu0 %v105_v31 }
  0x20   :  { %253 = vmatpush.msrb.mxu1 %v309_v5  ;;  %230 = vmatpush.msrb.mxu0 %v111_v39 }
  0x22   :  { %255 = vmatpush.msrb.mxu1 %v320_v9  ;;  %234 = vmatpush.msrb.mxu0 %v117_v43 }
  0x23   :  { %236 = vmatmul.f32.vlgmr.msrb.gmra.mxu0 %v56_v45 }
  0x24   :  { %257 = vmatpush.msrb.mxu1 %v322_v10 }
  0x26   :  { %259 = vmatpush.msrb.mxu1 %v324_v11 }
  0x28   :  { %261 = vmatpush.msrb.mxu1 %v343_v17 }
  0x2a   :  { %263 = vmatpush.msrb.mxu1 %v359_v24 }
  0x2b   :  { %265 = vmatmul.f32.vlgmr.msrb.gmra.mxu1 %v56_v45 }
  0x94   :  { %v62_v57 = vpop.f32.mrf.mxu0 }
  0x95   :  { %v63_v58 = vadd.f32 %v275_v56, %v62_v57 }
  0x98   :  { %v123_v59 = vpop.f32.mrf.mxu1  ;;  %v192_v63 = vpop.f32.mrf.mxu3 }
  0x99   :  { %v124_v61 = vadd.f32 %v123_v59, %v63_v58 }
  0x9a   :  { %v161_v60 = vpop.f32.mrf.mxu2 }
  0x9b   :  { %v162_v62 = vadd.f32 %v161_v60, %v124_v61 }
  0x9d   :  { %v193_v0 = vadd.f32 %v192_v63, %v162_v62 }
  0xa0   :  { %v237_v1 = vpop.f32.mrf.mxu0 }
  0xa1   :  { %v238_v2 = vadd.f32 %v237_v1, %v193_v0 }
  0xa8   :  { %v266_v3 = vpop.f32.mrf.mxu1 }
  0xa9   :  { %v267_v4 = vadd.f32 %v266_v3, %v238_v2 }
  0xab   :  { %270 = vst.msk [vmem:[%s419_s3] sm:$0xff] %vm269_vm1, %v267_v4 }

</bundles_post_ra>
